<compile_context>
chip_gen: v5e
topology: v5e:2x2
jax: 0.10.0
libtpu: 0.0.40
codegen_flags: <defaults>
</compile_context>

<pallas_src>
import functools

import jax
import jax.numpy as jnp
from jax.experimental import pallas as pl
from jax.experimental.pallas import tpu as pltpu

HIDDEN = 768  # fixed by the module definition: nn.Linear(in_f, 768)


def _linear_kernel(x_ref, w_ref, b_ref, o_ref, *, use_bf16: bool):
    # x_ref: (tm, in_f)    batch tile
    # w_ref: (in_f, N)     pre-transposed, lane-dense weight (resident across grid)
    # b_ref: (1, N)        bias, lane-major
    # o_ref: (tm, N)       output tile (N = 768, multiple of 128 -> unmasked stores)
    x = x_ref[...]
    w = w_ref[...]
    if use_bf16:
        x = x.astype(jnp.bfloat16)
        w = w.astype(jnp.bfloat16)
    acc = jnp.dot(x, w, preferred_element_type=jnp.float32)
    o_ref[...] = (acc + b_ref[...]).astype(o_ref.dtype)


def prepare_params(w1, b1):
    """One-time parameter prep (do this at load time, NOT per call).

    w1: (HIDDEN, in_f) float32  -- native PyTorch nn.Linear weight layout
    b1: (HIDDEN,)      float32
    Returns (w_t, b_2d) with w_t = (in_f, HIDDEN) lane-dense and b_2d = (1, HIDDEN).
    """
    return jnp.asarray(w1).T, jnp.asarray(b1).reshape(1, -1)


def _pick_tm(B: int) -> int:
    """Pick a batch tile: a multiple of 8 dividing B, capped at 512; else full B."""
    if B % 8 != 0:
        return B  # full-array block (allowed: equals the full dim)
    for cand in (512, 256, 128, 64, 32, 16, 8):
        if cand <= B and B % cand == 0:
            return cand
    return B


def mlp_forward(x, w_t, b_2d, *, use_bf16: bool = False):
    """Pallas implementation of mlp.forward: returns x @ W1.T + b1.

    x   : (B, in_f) float32
    w_t : (in_f, HIDDEN) float32  -- weight already transposed by prepare_params
    b_2d: (1, HIDDEN) float32
    """
    B, in_f = x.shape
    k, N = w_t.shape
    assert k == in_f
    assert b_2d.shape == (1, N)

    tm = _pick_tm(B)
    grid = (pl.cdiv(B, tm),)

    itemsize = 4
    # Per-step VMEM footprint (x/out double-buffered by the pipeline, weight+bias resident).
    step_bytes = (2 * tm * in_f + in_f * N + N + 2 * tm * N) * itemsize
    vmem_limit = None
    if step_bytes > (16 << 20):  # exceeds the most conservative default scoped limit (v5e)
        vmem_limit = min(step_bytes * 2, 64 << 20)  # cap at v7x physical VMEM

    bytes_accessed = (B * in_f + in_f * N + N + B * N) * itemsize
    cost = pl.CostEstimate(
        flops=2 * B * in_f * N,
        bytes_accessed=bytes_accessed,
        transcendentals=0,
    )

    kernel = functools.partial(_linear_kernel, use_bf16=use_bf16)

    return pl.pallas_call(
        kernel,
        out_shape=jax.ShapeDtypeStruct((B, N), x.dtype),
        grid=grid,
        in_specs=[
            pl.BlockSpec((tm, in_f), lambda i: (i, 0)),   # batch tile of x
            pl.BlockSpec((in_f, N), lambda i: (0, 0)),    # full weight, resident
            pl.BlockSpec((1, N), lambda i: (0, 0)),       # bias, resident
        ],
        out_specs=pl.BlockSpec((tm, N), lambda i: (i, 0)),  # lane-dense 768-wide tile
        compiler_params=pltpu.CompilerParams(
            dimension_semantics=("parallel",),
            vmem_limit_bytes=vmem_limit,
        ),
        cost_estimate=cost,
    )(x, w_t, b_2d)


def _reference(x, w1, b1):
    return x @ w1.T + b1


if __name__ == "__main__":
    key = jax.random.PRNGKey(0)
    k_x, k_w, k_b = jax.random.split(key, 3)

    batch, in_f, out_f = 8, 32, 16  # out_f is unused by forward(), kept for parity

    x = jax.random.normal(k_x, (batch, in_f), dtype=jnp.float32)

    # Deterministic parameter init mimicking nn.Linear's uniform(-1/sqrt(in_f), 1/sqrt(in_f))
    bound = 1.0 / jnp.sqrt(jnp.float32(in_f))
    w1 = jax.random.uniform(k_w, (HIDDEN, in_f), dtype=jnp.float32,
                            minval=-bound, maxval=bound)
    b1 = jax.random.uniform(k_b, (HIDDEN,), dtype=jnp.float32,
                            minval=-bound, maxval=bound)

    # TODO(synk): layer2 / Tanh parameters exist in __init__ but are dead in forward(); not implemented.

    # One-time parameter prep (transpose hoisted out of the per-call hot path).
    w_t, b_2d = prepare_params(w1, b1)

    out = mlp_forward(x, w_t, b_2d, use_bf16=False)
    out = jax.block_until_ready(out)

    ref = _reference(x, w1, b1)
    assert out.shape == (batch, HIDDEN)
    assert jnp.allclose(out, ref, atol=1e-4, rtol=1e-4)

    print("KERNEL_OK")
</pallas_src>

<mosaic_0001>
module attributes {stable_mosaic.version = 11 : i64} {
  func.func @_linear_kernel(%arg0: i32, %arg1: memref<8x32xf32, #tpu.memory_space<vmem>>, %arg2: memref<32x768xf32, #tpu.memory_space<vmem>>, %arg3: memref<1x768xf32, #tpu.memory_space<vmem>>, %arg4: memref<8x768xf32, #tpu.memory_space<vmem>>) attributes {dimension_semantics = [#tpu.dimension_semantics<parallel>], iteration_bounds = array<i64: 1>, scalar_prefetch = 0 : i64, scratch_operands = 0 : i64, tpu.core_type = #tpu.core_type<tc>, window_params = [{transform_indices = @transform_0, window_bounds = array<i64: 8, 32>}, {pipeline_mode = #tpu.pipeline_mode<synchronous>, transform_indices = @transform_1, window_bounds = array<i64: 32, 768>}, {pipeline_mode = #tpu.pipeline_mode<synchronous>, transform_indices = @transform_2, window_bounds = array<i64: 1, 768>}, {transform_indices = @transform_3, window_bounds = array<i64: 8, 768>}]} {
    %c0 = arith.constant 0 : index
    %c0_0 = arith.constant 0 : index
    %0 = vector.load %arg1[%c0, %c0_0] : memref<8x32xf32, #tpu.memory_space<vmem>>, vector<8x32xf32>
    %c0_1 = arith.constant 0 : index
    %c0_2 = arith.constant 0 : index
    %1 = vector.load %arg2[%c0_1, %c0_2] : memref<32x768xf32, #tpu.memory_space<vmem>>, vector<32x768xf32>
    %cst = arith.constant dense<0.000000e+00> : vector<8x768xf32>
    %2 = tpu.matmul %0, %1, %cst {dimension_numbers = #tpu.dot_dimension_numbers<[1], [0], [0], [1], [0, 0, 1, 1], [], []>} : vector<8x32xf32>, vector<32x768xf32>, vector<8x768xf32> -> vector<8x768xf32>
    %c0_3 = arith.constant 0 : index
    %c0_4 = arith.constant 0 : index
    %3 = vector.load %arg3[%c0_3, %c0_4] : memref<1x768xf32, #tpu.memory_space<vmem>>, vector<1x768xf32>
    %4 = vector.broadcast %3 : vector<1x768xf32> to vector<8x768xf32>
    %5 = arith.addf %2, %4 : vector<8x768xf32>
    %c0_5 = arith.constant 0 : index
    %c0_6 = arith.constant 0 : index
    %6 = vector.load %arg4[%c0_5, %c0_6] : memref<8x768xf32, #tpu.memory_space<vmem>>, vector<8x768xf32>
    tpu.vector_store %arg4[%c0_5, %c0_6], %5 {strides = array<i32>} : memref<8x768xf32, #tpu.memory_space<vmem>>, vector<8x768xf32>,
    return
  }
  func.func @transform_0(%arg0: i32) -> (i32, i32) {
    %c0_i32 = arith.constant 0 : i32
    %c0_i32_0 = arith.constant 0 : i32
    return %arg0, %c0_i32 : i32, i32
  }
  func.func @transform_1(%arg0: i32) -> (i32, i32) {
    %c0_i32 = arith.constant 0 : i32
    %c0_i32_0 = arith.constant 0 : i32
    %c0_i32_1 = arith.constant 0 : i32
    return %c0_i32, %c0_i32_0 : i32, i32
  }
  func.func @transform_2(%arg0: i32) -> (i32, i32) {
    %c0_i32 = arith.constant 0 : i32
    %c0_i32_0 = arith.constant 0 : i32
    %c0_i32_1 = arith.constant 0 : i32
    return %c0_i32, %c0_i32_0 : i32, i32
  }
  func.func @transform_3(%arg0: i32) -> (i32, i32) {
    %c0_i32 = arith.constant 0 : i32
    %c0_i32_0 = arith.constant 0 : i32
    return %arg0, %c0_i32 : i32, i32
  }
}

</mosaic_0001>

<bundles_post_ra>
// kernel: tpu_custom_call.1
= control target key start
LH: loop header
LB: loop body
LE: loop exit
PB: predicated region body
PF: predicated region fallthrough
CT: control target
= control target key end

     0   :  { %8 = vsyncpa [#allocation3], 0  ;;  %s403_s0 = inlined_call_operand.hbm [shape: f32[8,32], index: 0, kind: input, shape index: {}]   ;;  %s404_s1 = inlined_call_operand.hbm [shape: f32[32,768], index: 1, kind: input, shape index: {}]   ;;  %s405_s2 = inlined_call_operand.hbm [shape: f32[1,768], index: 2, kind: input, shape index: {}]   ;;  %s406_s3 = inlined_call_operand.hbm [shape: f32[8,768], index: 3, kind: output, shape index: {}]  }
   0x1   :  { %9 = vsyncpa [#allocation6], 0  ;;  %s26_s14 = sshll.u32 %s404_s1, 4  ;;  %s27_s14 = int_to_ptr.hbm [resolvable:$true] %s26_s14 }
   0x2   :  { %10 = vsyncpa [#allocation4], 0  ;;  %s359_s15 = smov [#allocation5]   ;;  %s16_s19 = sshll.u32 %s403_s0, 4  ;;  %s17_s19 = int_to_ptr.hbm [resolvable:$true] %s16_s19 }
   0x3   :  { %s28_s16 = sshll.u32 %s359_s15, 4  ;;  %s360_s20 = smov 768   ;;  %s29_s16 = int_to_ptr.vmem [resolvable:$true] %s28_s16 }
   0x4   :  { %s361_s21 = smov 48   ;;  %s362_s22 = smov [#allocation2]  }
   0x5   :  { %34 = dma.hbm_to_vmem [thread:$0]  %s27_s14, 3072, %s29_s16, [#allocation6], %s360_s20, %s360_s20, %s361_s21  }
   0x6   :  { %s18_s23 = sshll.u32 %s362_s22, 4  ;;  %s40_s26 = sshll.u32 %s405_s2, 4  ;;  %s19_s23 = int_to_ptr.vmem [resolvable:$true] %s18_s23  ;;  %s41_s26 = int_to_ptr.hbm [resolvable:$true] %s40_s26 }
   0x7   :  { %21 = dma.hbm_to_vmem [thread:$0]  %s17_s19, 128, %s19_s23, [#allocation3]  }
   0x8   :  { %s363_s1 = smov [#allocation7]  }
   0x9   :  { %s42_s27 = sshll.u32 %s363_s1, 4  ;;  %s43_s27 = int_to_ptr.vmem [resolvable:$true] %s42_s27 }
   0xa   :  { %45 = dma.hbm_to_vmem [thread:$0]  %s41_s26, 96, %s43_s27, [#allocation6]  }
   0xb   :  { %353 = dma.done.wait [#allocation3], 128  }
   0xc   :  { %354 = vsyncadd [#allocation3], 4294967168 }
   0xd   :  { %355 = dma.done.wait [#allocation6], 3168  }
   0xe   :  { %356 = vsyncadd [#allocation6], 4294964128  ;;  %v77_v0 = vld [vmem:[#allocation5 + $0x90] sm:$0xff]  ;;  %v78_v1 = vld [vmem:[#allocation5 + $0x98] sm:$0xff]  ;;  %vm97_vm0 = vcmask 261120   ;;  %s364_s0 = smov [#allocation8]  }
   0xf   :  { %v71_v2 = vld [vmem:[#allocation5 + $0x60] sm:$0xff]  ;;  %113 = vmatpush.msra.mxu0 %v77_v0  ;;  %133 = vmatpush.msra.mxu1 %v78_v1  ;;  %v72_v3 = vld [vmem:[#allocation5 + $0x68] sm:$0xff]  ;;  %v65_v6 = vld [vmem:[#allocation5 + $0x30] sm:$0xff]  ;;  %s232_s2 = sshll.u32 %s364_s0, 4  ;;  %s234_s30 = sshll.u32 %s406_s3, 4  ;;  %s233_s2 = int_to_ptr.vmem [resolvable:$true] %s232_s2  ;;  %s235_s30 = int_to_ptr.hbm [resolvable:$true] %s234_s30 }
  0x10   :  { %v79_v4 = vld [vmem:[#allocation5 + $0xa0] sm:$0xff]  ;;  %v80_v5 = vld [vmem:[#allocation5 + $0xa8] sm:$0xff]  ;;  %v66_v7 = vld [vmem:[#allocation5 + $0x38] sm:$0xff] }
  0x11   :  { %153 = vmatpush.msra.mxu2 %v79_v4  ;;  %173 = vmatpush.msra.mxu3 %v80_v5  ;;  %v73_v8 = vld [vmem:[#allocation5 + $0x70] sm:$0xff]  ;;  %v74_v9 = vld [vmem:[#allocation5 + $0x78] sm:$0xff]  ;;  %v59_v10 = vld [vmem:[#allocation5] sm:$0xff] }
  0x12   :  { %114 = vmatpush.msra.mxu0 %v71_v2  ;;  %134 = vmatpush.msra.mxu1 %v72_v3  ;;  %v60_v11 = vld [vmem:[#allocation5 + $0x8] sm:$0xff]  ;;  %v67_v12 = vld [vmem:[#allocation5 + $0x40] sm:$0xff]  ;;  %v58_v14 = vld [vmem:[#allocation2] sm:$0xff] }
  0x13   :  { %154 = vmatpush.msra.mxu2 %v73_v8  ;;  %174 = vmatpush.msra.mxu3 %v74_v9  ;;  %v68_v13 = vld [vmem:[#allocation5 + $0x48] sm:$0xff]  ;;  %v81_v15 = vld [vmem:[#allocation5 + $0xb0] sm:$0xff]  ;;  %v82_v16 = vld [vmem:[#allocation5 + $0xb8] sm:$0xff] }
  0x14   :  { %115 = vmatpush.msra.mxu0 %v65_v6  ;;  %135 = vmatpush.msra.mxu1 %v66_v7  ;;  %v61_v17 = vld [vmem:[#allocation5 + $0x10] sm:$0xff]  ;;  %v62_v18 = vld [vmem:[#allocation5 + $0x18] sm:$0xff]  ;;  %v75_v19 = vld [vmem:[#allocation5 + $0x80] sm:$0xff] }
  0x15   :  { %155 = vmatpush.msra.mxu2 %v67_v12  ;;  %175 = vmatpush.msra.mxu3 %v68_v13  ;;  %v76_v20 = vld [vmem:[#allocation5 + $0x88] sm:$0xff]  ;;  %v69_v21 = vld [vmem:[#allocation5 + $0x50] sm:$0xff]  ;;  %v70_v22 = vld [vmem:[#allocation5 + $0x58] sm:$0xff] }
  0x16   :  { %116 = vmatpush.msra.mxu0 %v59_v10  ;;  %136 = vmatpush.msra.mxu1 %v60_v11  ;;  %v63_v23 = vld [vmem:[#allocation5 + $0x20] sm:$0xff]  ;;  %v64_v24 = vld [vmem:[#allocation5 + $0x28] sm:$0xff] }
  0x17   :  { %245 = vmatmul.msk.f32.vlgmr.msra.gmra.mxu0 %vm97_vm0, %v58_v14  ;;  %246 = vmatmul.msk.f32.vlgmr.msra.gmra.mxu1 %vm97_vm0, %v58_v14  ;;  %v83_v25 = vld [vmem:[#allocation7] sm:$0x3f] }
  0x18   :  { %193 = vmatpush.msrb.mxu0 %v81_v15  ;;  %213 = vmatpush.msrb.mxu1 %v82_v16  ;;  %v85_v26 = vperm.slane %v83_v25, 0  ;;  %v86_v27 = vperm.slane %v83_v25, 1  ;;  %v87_v32 = vperm.slane %v83_v25, 2  ;;  %v88_v33 = vperm.slane %v83_v25, 3 }
  0x19   :  { %156 = vmatpush.msra.mxu2 %v61_v17  ;;  %176 = vmatpush.msra.mxu3 %v62_v18  ;;  %v89_v34 = vperm.slane %v83_v25, 4  ;;  %v90_v35 = vperm.slane %v83_v25, 5 }
  0x1a   :  { %247 = vmatmul.msk.f32.vlgmr.msra.gmra.mxu2 %vm97_vm0, %v58_v14  ;;  %248 = vmatmul.msk.f32.vlgmr.msra.gmra.mxu3 %vm97_vm0, %v58_v14 }
  0x1b   :  { %194 = vmatpush.msrb.mxu0 %v75_v19  ;;  %214 = vmatpush.msrb.mxu1 %v76_v20 }
  0x1d   :  { %195 = vmatpush.msrb.mxu0 %v69_v21  ;;  %215 = vmatpush.msrb.mxu1 %v70_v22 }
  0x1f   :  { %196 = vmatpush.msrb.mxu0 %v63_v23  ;;  %216 = vmatpush.msrb.mxu1 %v64_v24 }
  0x20   :  { %249 = vmatmul.msk.f32.vlgmr.msrb.gmra.mxu0 %vm97_vm0, %v58_v14  ;;  %250 = vmatmul.msk.f32.vlgmr.msrb.gmra.mxu1 %vm97_vm0, %v58_v14 }
  0x94   :  { %v118_v28 = vpop.f32.mrf.mxu0  ;;  %v138_v29 = vpop.f32.mrf.mxu1 }
  0x95   :  { %v119_v30 = vadd.f32 %v118_v28, %v85_v26  ;;  %v139_v31 = vadd.f32 %v138_v29, %v86_v27 }
  0x97   :  { %221 = vst [vmem:[#allocation8] sm:$0xff] %v119_v30 }
  0x98   :  { %222 = vst [vmem:[#allocation8 + $0x8] sm:$0xff] %v139_v31 }
  0x9d   :  { %v158_v36 = vpop.f32.mrf.mxu2  ;;  %v178_v37 = vpop.f32.mrf.mxu3 }
  0x9e   :  { %v159_v38 = vadd.f32 %v158_v36, %v87_v32  ;;  %v179_v39 = vadd.f32 %v178_v37, %v88_v33  ;;  %v198_v40 = vpop.f32.mrf.mxu0  ;;  %v218_v41 = vpop.f32.mrf.mxu1 }
  0x9f   :  { %v199_v42 = vadd.f32 %v198_v40, %v89_v34  ;;  %v219_v43 = vadd.f32 %v218_v41, %v90_v35 }
  0xa0   :  { %223 = vst [vmem:[#allocation8 + $0x10] sm:$0xff] %v159_v38 }
  0xa1   :  { %224 = vst [vmem:[#allocation8 + $0x18] sm:$0xff] %v179_v39 }
  0xa2   :  { %225 = vst [vmem:[#allocation8 + $0x20] sm:$0xff] %v199_v42 }
  0xa3   :  { %226 = vst [vmem:[#allocation8 + $0x28] sm:$0xff] %v219_v43 }
  0xa4   :  { %237 = dma.vmem_to_hbm [thread:$0]  %s233_s2, 768, %s235_s30, [#allocation4]  }
  0xa5   :  { %357 = dma.done.wait [#allocation4], 768  }
  0xa6   :  { %358 = vsyncadd [#allocation4], 4294966528 }
  0xa7   :  { %242 = vsyncpa [#allocation3], 1 }
  0xa8   :  { %243 = vsyncpa [#allocation6], 1 }
  0xa9   :  { %244 = vsyncpa [#allocation4], 1 }

</bundles_post_ra>
